<compile_context>
chip_gen: v7x
topology: tpu7x:2x2x1
jax: 0.10.0
libtpu: 0.0.40
codegen_flags: <defaults>
</compile_context>

<pallas_src>
import functools

import jax
import jax.numpy as jnp
from jax.experimental import pallas as pl
from jax.experimental.pallas import tpu as pltpu

H_REAL = 100          # h_dim1 == h_dim2 == 100 in the PyTorch module
H_PAD = 128           # lane-dense padding of the hidden dims
LEAKY_SLOPE = 0.01    # nn.LeakyReLU default
LN_EPS = 1e-5         # nn.LayerNorm default
E_BLK_MAX = 32        # edges per grid step (VMEM-safe on v5e/v6e/v7x)


def _round_up(n, m):
    return ((n + m - 1) // m) * m


# ----------------------------------------------------------------------------
# Kernel
# ----------------------------------------------------------------------------
def _edge_block_kernel(x_ref, w1_ref, w2_ref, wo_ref, vec_ref, o_ref, *, op_pad):
    # x_ref:   (E_BLK, DT_PAD, IP_PAD)  f32
    # w1_ref:  (E_BLK, IP_PAD, H_PAD)   bf16
    # w2_ref:  (E_BLK, H_PAD,  H_PAD)   bf16
    # wo_ref:  (E_BLK, H_PAD,  OP_PAD)  bf16
    # vec_ref: (E_BLK, 8, VP)           f32  rows: b1,g1,be1,b2,g2,be2,bo,pad
    # o_ref:   (E_BLK, DT_PAD, OP_PAD)  f32
    lane = jax.lax.broadcasted_iota(jnp.int32, (1, 1, H_PAD), 2)
    hmask = (lane < H_REAL).astype(jnp.float32)

    def leaky(h):
        return jnp.where(h >= 0, h, LEAKY_SLOPE * h)

    def layernorm(h, gamma, beta):
        # Statistics over the 100 real features only (padded lanes masked).
        mu = jnp.sum(h * hmask, axis=-1, keepdims=True) * (1.0 / H_REAL)
        d = (h - mu) * hmask
        var = jnp.sum(d * d, axis=-1, keepdims=True) * (1.0 / H_REAL)
        return d * jax.lax.rsqrt(var + LN_EPS) * gamma + beta

    x = x_ref[...]
    vecs = vec_ref[...]
    b1 = vecs[:, 0:1, 0:H_PAD]
    g1 = vecs[:, 1:2, 0:H_PAD]
    be1 = vecs[:, 2:3, 0:H_PAD]
    b2 = vecs[:, 3:4, 0:H_PAD]
    g2 = vecs[:, 4:5, 0:H_PAD]
    be2 = vecs[:, 5:6, 0:H_PAD]
    bo = vecs[:, 6:7, 0:op_pad]

    # linear1 -> LeakyReLU -> LayerNorm (dropout = identity)
    h = jnp.einsum('edi,eih->edh', x.astype(jnp.bfloat16), w1_ref[...],
                   preferred_element_type=jnp.float32) + b1
    h = layernorm(leaky(h), g1, be1)

    # linear2 -> LeakyReLU -> LayerNorm (dropout = identity)
    h = jnp.einsum('edh,ehk->edk', h.astype(jnp.bfloat16), w2_ref[...],
                   preferred_element_type=jnp.float32) + b2
    h = layernorm(leaky(h), g2, be2)

    # output linear (dropout = identity)
    out = jnp.einsum('edh,eho->edo', h.astype(jnp.bfloat16), wo_ref[...],
                     preferred_element_type=jnp.float32) + bo
    o_ref[...] = out.astype(o_ref.dtype)


# ----------------------------------------------------------------------------
# Parameter packing (done once, outside the hot path)
# ----------------------------------------------------------------------------
def prepare_params(params, op_dim):
    """Pad / pack / cast the raw per-edge parameters for the kernel."""
    w1 = params["w1"]
    num_edges, ip_dim, _ = w1.shape
    e_blk = min(E_BLK_MAX, num_edges)
    e_pad = _round_up(num_edges, e_blk)
    ip_pad = _round_up(ip_dim, 128)
    op_pad = _round_up(op_dim, 128)
    vp = max(H_PAD, op_pad)

    def pad3(w, d1, d2):
        return jnp.pad(w, ((0, e_pad - num_edges),
                           (0, d1 - w.shape[1]),
                           (0, d2 - w.shape[2])))

    def padvec(v, width):
        return jnp.pad(v, ((0, e_pad - num_edges), (0, width - v.shape[1])))

    packed = {
        "w1": pad3(params["w1"], ip_pad, H_PAD).astype(jnp.bfloat16),
        "w2": pad3(params["w2"], H_PAD, H_PAD).astype(jnp.bfloat16),
        "wo": pad3(params["wo"], H_PAD, op_pad).astype(jnp.bfloat16),
        "vecs": jnp.stack(
            [padvec(params["b1"], vp), padvec(params["g1"], vp),
             padvec(params["be1"], vp), padvec(params["b2"], vp),
             padvec(params["g2"], vp), padvec(params["be2"], vp),
             padvec(params["bo"], vp),
             jnp.zeros((e_pad, vp), jnp.float32)],
            axis=1).astype(jnp.float32),                      # (E_pad, 8, VP)
        "num_edges": num_edges, "op_dim": op_dim,
        "e_blk": e_blk, "e_pad": e_pad,
        "ip_pad": ip_pad, "op_pad": op_pad, "vp": vp,
    }
    return packed


# ----------------------------------------------------------------------------
# Forward wrapper
# ----------------------------------------------------------------------------
def rt_nw_forward(x, packed):
    """x: (dtpt, num_edges, ip_dim) f32.  Returns (dtpt, num_edges, op_dim)."""
    dtpt, num_edges, ip_dim = x.shape
    assert num_edges == packed["num_edges"]
    e_blk, e_pad = packed["e_blk"], packed["e_pad"]
    ip_pad, op_pad, vp = packed["ip_pad"], packed["op_pad"], packed["vp"]
    op_dim = packed["op_dim"]
    dt_pad = _round_up(dtpt, 8)

    # Edge-major + pad (single cheap materialization at tiny dtpt; keeps the
    # in-kernel einsums relayout-free).
    x_e = jnp.transpose(x, (1, 0, 2))
    x_e = jnp.pad(x_e, ((0, e_pad - num_edges),
                        (0, dt_pad - dtpt),
                        (0, ip_pad - ip_dim)))

    kernel = functools.partial(_edge_block_kernel, op_pad=op_pad)

    out_padded = pl.pallas_call(
        kernel,
        out_shape=jax.ShapeDtypeStruct((e_pad, dt_pad, op_pad), jnp.float32),
        grid=(e_pad // e_blk,),
        in_specs=[
            pl.BlockSpec((e_blk, dt_pad, ip_pad), lambda e: (e, 0, 0)),   # x
            pl.BlockSpec((e_blk, ip_pad, H_PAD), lambda e: (e, 0, 0)),    # w1
            pl.BlockSpec((e_blk, H_PAD, H_PAD), lambda e: (e, 0, 0)),     # w2
            pl.BlockSpec((e_blk, H_PAD, op_pad), lambda e: (e, 0, 0)),    # wo
            pl.BlockSpec((e_blk, 8, vp), lambda e: (e, 0, 0)),            # vecs
        ],
        out_specs=pl.BlockSpec((e_blk, dt_pad, op_pad), lambda e: (e, 0, 0)),
        compiler_params=pltpu.CompilerParams(
            dimension_semantics=("parallel",),
            vmem_limit_bytes=64 * 1024 * 1024,
        ),
    )(x_e, packed["w1"], packed["w2"], packed["wo"], packed["vecs"])

    out_edges = out_padded[:num_edges, :dtpt, :op_dim]        # (E, dtpt, op)
    # Reproduce: tmp_op = cat([edge0, edge1, ...], dim=0) -> (E*dtpt, op_dim)
    #            output = tmp_op.reshape(dtpt, E, op_dim)
    return out_edges.reshape(dtpt, num_edges, op_dim)


# ----------------------------------------------------------------------------
# Raw (PyTorch-shaped) parameter init + pure-JAX reference
# ----------------------------------------------------------------------------
def init_params(key, num_edges, ip_dim, op_dim):
    ks = jax.random.split(key, 6)

    def u(k, shape, fan_in):
        bound = 1.0 / jnp.sqrt(fan_in)
        return jax.random.uniform(k, shape, jnp.float32, -bound, bound)

    return {
        "w1": u(ks[0], (num_edges, ip_dim, H_REAL), ip_dim),
        "b1": u(ks[1], (num_edges, H_REAL), ip_dim),
        "g1": jnp.ones((num_edges, H_REAL), jnp.float32),
        "be1": jnp.zeros((num_edges, H_REAL), jnp.float32),
        "w2": u(ks[2], (num_edges, H_REAL, H_REAL), H_REAL),
        "b2": u(ks[3], (num_edges, H_REAL), H_REAL),
        "g2": jnp.ones((num_edges, H_REAL), jnp.float32),
        "be2": jnp.zeros((num_edges, H_REAL), jnp.float32),
        "wo": u(ks[4], (num_edges, H_REAL, op_dim), H_REAL),
        "bo": u(ks[5], (num_edges, op_dim), H_REAL),
    }


def _ln_ref(h, g, b):
    mu = jnp.mean(h, axis=-1, keepdims=True)
    var = jnp.mean((h - mu) ** 2, axis=-1, keepdims=True)
    return (h - mu) * jax.lax.rsqrt(var + LN_EPS) * g + b


def _reference_forward(x, params):
    dtpt, num_edges, _ = x.shape
    op_dim = params["bo"].shape[-1]
    outs = []
    for e in range(num_edges):
        h = x[:, e, :] @ params["w1"][e] + params["b1"][e]
        h = jnp.where(h >= 0, h, LEAKY_SLOPE * h)
        h = _ln_ref(h, params["g1"][e], params["be1"][e])
        h = h @ params["w2"][e] + params["b2"][e]
        h = jnp.where(h >= 0, h, LEAKY_SLOPE * h)
        h = _ln_ref(h, params["g2"][e], params["be2"][e])
        outs.append(h @ params["wo"][e] + params["bo"][e])
    tmp = jnp.concatenate(outs, axis=0)                       # (E*dtpt, op)
    return tmp.reshape(dtpt, num_edges, op_dim)


if __name__ == "__main__":
    ip_dim = 16
    num_edges = 3
    op_dim = 8
    dtpt = 4

    key = jax.random.PRNGKey(0)
    k_x, k_p = jax.random.split(key)
    x = jax.random.normal(k_x, (dtpt, num_edges, ip_dim), jnp.float32)
    raw_params = init_params(k_p, num_edges, ip_dim, op_dim)
    packed = prepare_params(raw_params, op_dim)

    out = rt_nw_forward(x, packed)
    out = jax.block_until_ready(out)

    assert out.shape == (dtpt, num_edges, op_dim), out.shape
    assert bool(jnp.all(jnp.isfinite(out)))

    # Cross-check against a pure-JAX f32 reference of the PyTorch module
    # (loose tolerance: kernel uses bf16 matmul inputs with f32 accumulation).
    ref = _reference_forward(x, raw_params)
    max_err = float(jnp.max(jnp.abs(out - ref)))
    assert max_err < 0.15, f"max abs error vs reference: {max_err}"

    print("KERNEL_OK")
</pallas_src>

<mosaic_0001>
module attributes {stable_mosaic.version = 11 : i64} {
  func.func @_edge_block_kernel(%arg0: i32, %arg1: memref<3x8x128xf32, #tpu.memory_space<vmem>>, %arg2: memref<3x128x128xbf16, #tpu.memory_space<vmem>>, %arg3: memref<3x128x128xbf16, #tpu.memory_space<vmem>>, %arg4: memref<3x128x128xbf16, #tpu.memory_space<vmem>>, %arg5: memref<3x8x128xf32, #tpu.memory_space<vmem>>, %arg6: memref<3x8x128xf32, #tpu.memory_space<vmem>>) attributes {dimension_semantics = [#tpu.dimension_semantics<parallel>], iteration_bounds = array<i64: 1>, scalar_prefetch = 0 : i64, scratch_operands = 0 : i64, tpu.core_type = #tpu.core_type<tc>, window_params = [{transform_indices = @transform_0, window_bounds = array<i64: 3, 8, 128>}, {transform_indices = @transform_1, window_bounds = array<i64: 3, 128, 128>}, {transform_indices = @transform_2, window_bounds = array<i64: 3, 128, 128>}, {transform_indices = @transform_3, window_bounds = array<i64: 3, 128, 128>}, {transform_indices = @transform_4, window_bounds = array<i64: 3, 8, 128>}, {transform_indices = @transform_5, window_bounds = array<i64: 3, 8, 128>}]} {
    %0 = tpu.iota {dimensions = array<i32: 2>} : vector<1x1x128xi32>
    %c100_i32 = arith.constant 100 : i32
    %1 = vector.broadcast %c100_i32 : i32 to vector<1x1x128xi32>
    %2 = arith.cmpi slt, %0, %1 : vector<1x1x128xi32>
    %3 = arith.extui %2 : vector<1x1x128xi1> to vector<1x1x128xi32>
    %4 = arith.sitofp %3 : vector<1x1x128xi32> to vector<1x1x128xf32>
    %c0 = arith.constant 0 : index
    %c0_0 = arith.constant 0 : index
    %c0_1 = arith.constant 0 : index
    %5 = vector.load %arg1[%c0, %c0_0, %c0_1] : memref<3x8x128xf32, #tpu.memory_space<vmem>>, vector<3x8x128xf32>
    %c0_2 = arith.constant 0 : index
    %c0_3 = arith.constant 0 : index
    %c0_4 = arith.constant 0 : index
    %6 = vector.load %arg5[%c0_2, %c0_3, %c0_4] : memref<3x8x128xf32, #tpu.memory_space<vmem>>, vector<3x8x128xf32>
    %7 = vector.extract_strided_slice %6 {offsets = [0, 0, 0], sizes = [3, 1, 128], strides = [1, 1, 1]} : vector<3x8x128xf32> to vector<3x1x128xf32>
    %8 = vector.extract_strided_slice %6 {offsets = [0, 1, 0], sizes = [3, 1, 128], strides = [1, 1, 1]} : vector<3x8x128xf32> to vector<3x1x128xf32>
    %9 = vector.extract_strided_slice %6 {offsets = [0, 2, 0], sizes = [3, 1, 128], strides = [1, 1, 1]} : vector<3x8x128xf32> to vector<3x1x128xf32>
    %10 = vector.extract_strided_slice %6 {offsets = [0, 3, 0], sizes = [3, 1, 128], strides = [1, 1, 1]} : vector<3x8x128xf32> to vector<3x1x128xf32>
    %11 = vector.extract_strided_slice %6 {offsets = [0, 4, 0], sizes = [3, 1, 128], strides = [1, 1, 1]} : vector<3x8x128xf32> to vector<3x1x128xf32>
    %12 = vector.extract_strided_slice %6 {offsets = [0, 5, 0], sizes = [3, 1, 128], strides = [1, 1, 1]} : vector<3x8x128xf32> to vector<3x1x128xf32>
    %13 = vector.extract_strided_slice %6 {offsets = [0, 6, 0], sizes = [3, 1, 128], strides = [1, 1, 1]} : vector<3x8x128xf32> to vector<3x1x128xf32>
    %14 = arith.truncf %5 : vector<3x8x128xf32> to vector<3x8x128xbf16>
    %c0_5 = arith.constant 0 : index
    %c0_6 = arith.constant 0 : index
    %c0_7 = arith.constant 0 : index
    %15 = vector.load %arg2[%c0_5, %c0_6, %c0_7] : memref<3x128x128xbf16, #tpu.memory_space<vmem>>, vector<3x128x128xbf16>
    "tpu.trace_start"() <{level = 10 : i32, message = "edi,eih->edh"}> : () -> ()
    %cst = arith.constant dense<0.000000e+00> : vector<3x8x128xf32>
    %16 = tpu.matmul %14, %15, %cst {dimension_numbers = #tpu.dot_dimension_numbers<[2], [1], [1], [2], [0, 0, 0, 1, 1, 2], [0], [0]>} : vector<3x8x128xbf16>, vector<3x128x128xbf16>, vector<3x8x128xf32> -> vector<3x8x128xf32>
    "tpu.trace_stop"() : () -> ()
    %17 = vector.broadcast %7 : vector<3x1x128xf32> to vector<3x8x128xf32>
    %18 = arith.addf %16, %17 : vector<3x8x128xf32>
    %cst_8 = arith.constant 0.000000e+00 : f32
    %19 = vector.broadcast %cst_8 : f32 to vector<3x8x128xf32>
    %20 = arith.cmpf oge, %18, %19 : vector<3x8x128xf32>
    %cst_9 = arith.constant 0.00999999977 : f32
    %21 = vector.broadcast %cst_9 : f32 to vector<3x8x128xf32>
    %22 = arith.mulf %21, %18 : vector<3x8x128xf32>
    %23 = arith.select %20, %18, %22 : vector<3x8x128xi1>, vector<3x8x128xf32>
    %24 = vector.broadcast %4 : vector<1x1x128xf32> to vector<3x8x128xf32>
    %25 = arith.mulf %23, %24 : vector<3x8x128xf32>
    %cst_10 = arith.constant dense<0.000000e+00> : vector<3x8xf32>
    %26 = vector.multi_reduction <add>, %25, %cst_10 [2] : vector<3x8x128xf32> to vector<3x8xf32>
    %27 = vector.shape_cast %26 : vector<3x8xf32> to vector<3x8x1xf32>
    %cst_11 = arith.constant 0.00999999977 : f32
    %28 = vector.broadcast %cst_11 : f32 to vector<3x8x1xf32>
    %29 = arith.mulf %27, %28 : vector<3x8x1xf32>
    %30 = vector.broadcast %29 : vector<3x8x1xf32> to vector<3x8x128xf32>
    %31 = arith.subf %23, %30 : vector<3x8x128xf32>
    %32 = vector.broadcast %4 : vector<1x1x128xf32> to vector<3x8x128xf32>
    %33 = arith.mulf %31, %32 : vector<3x8x128xf32>
    %34 = arith.mulf %33, %33 : vector<3x8x128xf32>
    %cst_12 = arith.constant dense<0.000000e+00> : vector<3x8xf32>
    %35 = vector.multi_reduction <add>, %34, %cst_12 [2] : vector<3x8x128xf32> to vector<3x8xf32>
    %36 = vector.shape_cast %35 : vector<3x8xf32> to vector<3x8x1xf32>
    %cst_13 = arith.constant 0.00999999977 : f32
    %37 = vector.broadcast %cst_13 : f32 to vector<3x8x1xf32>
    %38 = arith.mulf %36, %37 : vector<3x8x1xf32>
    %cst_14 = arith.constant 9.99999974E-6 : f32
    %39 = vector.broadcast %cst_14 : f32 to vector<3x8x1xf32>
    %40 = arith.addf %38, %39 : vector<3x8x1xf32>
    %41 = math.rsqrt %40 : vector<3x8x1xf32>
    %42 = vector.broadcast %41 : vector<3x8x1xf32> to vector<3x8x128xf32>
    %43 = arith.mulf %33, %42 : vector<3x8x128xf32>
    %44 = vector.broadcast %8 : vector<3x1x128xf32> to vector<3x8x128xf32>
    %45 = arith.mulf %43, %44 : vector<3x8x128xf32>
    %46 = vector.broadcast %9 : vector<3x1x128xf32> to vector<3x8x128xf32>
    %47 = arith.addf %45, %46 : vector<3x8x128xf32>
    %48 = arith.truncf %47 : vector<3x8x128xf32> to vector<3x8x128xbf16>
    %c0_15 = arith.constant 0 : index
    %c0_16 = arith.constant 0 : index
    %c0_17 = arith.constant 0 : index
    %49 = vector.load %arg3[%c0_15, %c0_16, %c0_17] : memref<3x128x128xbf16, #tpu.memory_space<vmem>>, vector<3x128x128xbf16>
    "tpu.trace_start"() <{level = 10 : i32, message = "edh,ehk->edk"}> : () -> ()
    %cst_18 = arith.constant dense<0.000000e+00> : vector<3x8x128xf32>
    %50 = tpu.matmul %48, %49, %cst_18 {dimension_numbers = #tpu.dot_dimension_numbers<[2], [1], [1], [2], [0, 0, 0, 1, 1, 2], [0], [0]>} : vector<3x8x128xbf16>, vector<3x128x128xbf16>, vector<3x8x128xf32> -> vector<3x8x128xf32>
    "tpu.trace_stop"() : () -> ()
    %51 = vector.broadcast %10 : vector<3x1x128xf32> to vector<3x8x128xf32>
    %52 = arith.addf %50, %51 : vector<3x8x128xf32>
    %cst_19 = arith.constant 0.000000e+00 : f32
    %53 = vector.broadcast %cst_19 : f32 to vector<3x8x128xf32>
    %54 = arith.cmpf oge, %52, %53 : vector<3x8x128xf32>
    %cst_20 = arith.constant 0.00999999977 : f32
    %55 = vector.broadcast %cst_20 : f32 to vector<3x8x128xf32>
    %56 = arith.mulf %55, %52 : vector<3x8x128xf32>
    %57 = arith.select %54, %52, %56 : vector<3x8x128xi1>, vector<3x8x128xf32>
    %58 = vector.broadcast %4 : vector<1x1x128xf32> to vector<3x8x128xf32>
    %59 = arith.mulf %57, %58 : vector<3x8x128xf32>
    %cst_21 = arith.constant dense<0.000000e+00> : vector<3x8xf32>
    %60 = vector.multi_reduction <add>, %59, %cst_21 [2] : vector<3x8x128xf32> to vector<3x8xf32>
    %61 = vector.shape_cast %60 : vector<3x8xf32> to vector<3x8x1xf32>
    %cst_22 = arith.constant 0.00999999977 : f32
    %62 = vector.broadcast %cst_22 : f32 to vector<3x8x1xf32>
    %63 = arith.mulf %61, %62 : vector<3x8x1xf32>
    %64 = vector.broadcast %63 : vector<3x8x1xf32> to vector<3x8x128xf32>
    %65 = arith.subf %57, %64 : vector<3x8x128xf32>
    %66 = vector.broadcast %4 : vector<1x1x128xf32> to vector<3x8x128xf32>
    %67 = arith.mulf %65, %66 : vector<3x8x128xf32>
    %68 = arith.mulf %67, %67 : vector<3x8x128xf32>
    %cst_23 = arith.constant dense<0.000000e+00> : vector<3x8xf32>
    %69 = vector.multi_reduction <add>, %68, %cst_23 [2] : vector<3x8x128xf32> to vector<3x8xf32>
    %70 = vector.shape_cast %69 : vector<3x8xf32> to vector<3x8x1xf32>
    %cst_24 = arith.constant 0.00999999977 : f32
    %71 = vector.broadcast %cst_24 : f32 to vector<3x8x1xf32>
    %72 = arith.mulf %70, %71 : vector<3x8x1xf32>
    %cst_25 = arith.constant 9.99999974E-6 : f32
    %73 = vector.broadcast %cst_25 : f32 to vector<3x8x1xf32>
    %74 = arith.addf %72, %73 : vector<3x8x1xf32>
    %75 = math.rsqrt %74 : vector<3x8x1xf32>
    %76 = vector.broadcast %75 : vector<3x8x1xf32> to vector<3x8x128xf32>
    %77 = arith.mulf %67, %76 : vector<3x8x128xf32>
    %78 = vector.broadcast %11 : vector<3x1x128xf32> to vector<3x8x128xf32>
    %79 = arith.mulf %77, %78 : vector<3x8x128xf32>
    %80 = vector.broadcast %12 : vector<3x1x128xf32> to vector<3x8x128xf32>
    %81 = arith.addf %79, %80 : vector<3x8x128xf32>
    %82 = arith.truncf %81 : vector<3x8x128xf32> to vector<3x8x128xbf16>
    %c0_26 = arith.constant 0 : index
    %c0_27 = arith.constant 0 : index
    %c0_28 = arith.constant 0 : index
    %83 = vector.load %arg4[%c0_26, %c0_27, %c0_28] : memref<3x128x128xbf16, #tpu.memory_space<vmem>>, vector<3x128x128xbf16>
    "tpu.trace_start"() <{level = 10 : i32, message = "edh,eho->edo"}> : () -> ()
    %cst_29 = arith.constant dense<0.000000e+00> : vector<3x8x128xf32>
    %84 = tpu.matmul %82, %83, %cst_29 {dimension_numbers = #tpu.dot_dimension_numbers<[2], [1], [1], [2], [0, 0, 0, 1, 1, 2], [0], [0]>} : vector<3x8x128xbf16>, vector<3x128x128xbf16>, vector<3x8x128xf32> -> vector<3x8x128xf32>
    "tpu.trace_stop"() : () -> ()
    %85 = vector.broadcast %13 : vector<3x1x128xf32> to vector<3x8x128xf32>
    %86 = arith.addf %84, %85 : vector<3x8x128xf32>
    %c0_30 = arith.constant 0 : index
    %c0_31 = arith.constant 0 : index
    %c0_32 = arith.constant 0 : index
    %87 = vector.load %arg6[%c0_30, %c0_31, %c0_32] : memref<3x8x128xf32, #tpu.memory_space<vmem>>, vector<3x8x128xf32>
    tpu.vector_store %arg6[%c0_30, %c0_31, %c0_32], %86 {strides = array<i32>} : memref<3x8x128xf32, #tpu.memory_space<vmem>>, vector<3x8x128xf32>,
    return
  }
  func.func @transform_0(%arg0: i32) -> (i32, i32, i32) {
    %c0_i32 = arith.constant 0 : i32
    %c0_i32_0 = arith.constant 0 : i32
    %c0_i32_1 = arith.constant 0 : i32
    return %arg0, %c0_i32, %c0_i32_0 : i32, i32, i32
  }
  func.func @transform_1(%arg0: i32) -> (i32, i32, i32) {
    %c0_i32 = arith.constant 0 : i32
    %c0_i32_0 = arith.constant 0 : i32
    %c0_i32_1 = arith.constant 0 : i32
    return %arg0, %c0_i32, %c0_i32_0 : i32, i32, i32
  }
  func.func @transform_2(%arg0: i32) -> (i32, i32, i32) {
    %c0_i32 = arith.constant 0 : i32
    %c0_i32_0 = arith.constant 0 : i32
    %c0_i32_1 = arith.constant 0 : i32
    return %arg0, %c0_i32, %c0_i32_0 : i32, i32, i32
  }
  func.func @transform_3(%arg0: i32) -> (i32, i32, i32) {
    %c0_i32 = arith.constant 0 : i32
    %c0_i32_0 = arith.constant 0 : i32
    %c0_i32_1 = arith.constant 0 : i32
    return %arg0, %c0_i32, %c0_i32_0 : i32, i32, i32
  }
  func.func @transform_4(%arg0: i32) -> (i32, i32, i32) {
    %c0_i32 = arith.constant 0 : i32
    %c0_i32_0 = arith.constant 0 : i32
    %c0_i32_1 = arith.constant 0 : i32
    return %arg0, %c0_i32, %c0_i32_0 : i32, i32, i32
  }
  func.func @transform_5(%arg0: i32) -> (i32, i32, i32) {
    %c0_i32 = arith.constant 0 : i32
    %c0_i32_0 = arith.constant 0 : i32
    %c0_i32_1 = arith.constant 0 : i32
    return %arg0, %c0_i32, %c0_i32_0 : i32, i32, i32
  }
}

</mosaic_0001>

<bundles_post_ra>
// kernel: tpu_custom_call.1
= control target key start
LH: loop header
LB: loop body
LE: loop exit
PB: predicated region body
PF: predicated region fallthrough
CT: control target
= control target key end

     0   :  { %10 = vsyncpa [#allocation3], 0  ;;  %s2133_s0 = inlined_call_operand.hbm [shape: f32[3,8,128], index: 0, kind: input, shape index: {}]   ;;  %s2134_s1 = inlined_call_operand.hbm [shape: bf16[3,128,128], index: 1, kind: input, shape index: {}]   ;;  %s2135_s2 = inlined_call_operand.hbm [shape: bf16[3,128,128], index: 2, kind: input, shape index: {}]   ;;  %s2136_s3 = inlined_call_operand.hbm [shape: bf16[3,128,128], index: 3, kind: input, shape index: {}]   ;;  %s2137_s4 = inlined_call_operand.hbm [shape: f32[3,8,128], index: 4, kind: input, shape index: {}]   ;;  %s2138_s5 = inlined_call_operand.hbm [shape: f32[3,8,128], index: 5, kind: output, shape index: {}]  }
   0x1   :  { %11 = vsyncpa [#allocation6], 0 }
   0x2   :  { %12 = vsyncpa [#allocation9], 0 }
   0x3   :  { %13 = vsyncpa [#allocation4], 0  ;;  %s1830_s18 = smov [#allocation5]   ;;  %s1690_s22 = scalar_lea.hbm %s2134_s1, 3072 }
   0x4   :  { %s31_s19 = sshll.u32 %s1830_s18, 4  ;;  %p1691_p0 = scmp.ne.s32.totalorder %s2134_s1, %s1690_s22  ;;  %s32_s19 = int_to_ptr.vmem [resolvable:$true] %s31_s19 }
   0x5   :  { %p1694_p1 = scmp.lt.u32.totalorder %s1690_s22, %s2134_s1 }
   0x7   :  { %p1696_p2 = pnand %p1694_p1, %p1691_p0 }
   0x9   :  { %1699 = shalt.err (!%p1696_p2)
}
   0xa   :  { %s1700_s27 = scalar_lea.vmem %s32_s19, 3072  ;;  %p1705_p4 = scmp.lt.s32.totalorder %s32_s19, %s32_s19 }
   0xb   :  { %p1701_p3 = scmp.ne.s32.totalorder %s32_s19, %s1700_s27  ;;  %p1706_p5 = scmp.lt.s32.totalorder %s1700_s27, %s1700_s27 }
   0xd   :  { %p1707_p6 = por %p1706_p5, %p1705_p4 }
   0xf   :  { %p1708_p7 = pnand %p1707_p6, %p1701_p3 }
  0x11   :  { %1711 = shalt.err (!%p1708_p7)
}
  0x12   :  { %s1831_s28 = smov 64   ;;  %s1832_s29 = smov 4  }
  0x13   :  { %37 = dma.hbm_to_vmem [thread:$0]  %s2134_s1, 3072, %s32_s19, [#allocation6], %s1831_s28, %s1831_s28, %s1832_s29  }
  0x14   :  { %s1833_s7 = smov [#allocation8]   ;;  %s1834_s9 = smov [#allocation2]  }
  0x15   :  { %s55_s8 = sshll.u32 %s1833_s7, 4  ;;  %s19_s10 = sshll.u32 %s1834_s9, 4  ;;  %s56_s8 = int_to_ptr.vmem [resolvable:$true] %s55_s8  ;;  %s20_s10 = int_to_ptr.vmem [resolvable:$true] %s19_s10 }
  0x16   :  { %s1712_s13 = scalar_lea.hbm %s2136_s3, 3072 }
  0x17   :  { %p1713_p8 = scmp.ne.s32.totalorder %s2136_s3, %s1712_s13  ;;  %p1716_p9 = scmp.lt.u32.totalorder %s1712_s13, %s2136_s3 }
  0x19   :  { %p1718_p10 = pnand %p1716_p9, %p1713_p8 }
  0x1b   :  { %1721 = shalt.err (!%p1718_p10)
}
  0x1c   :  { %s1722_s1 = scalar_lea.vmem %s56_s8, 3072  ;;  %p1727_p12 = scmp.lt.s32.totalorder %s56_s8, %s56_s8 }
  0x1d   :  { %p1723_p11 = scmp.ne.s32.totalorder %s56_s8, %s1722_s1  ;;  %p1728_p13 = scmp.lt.s32.totalorder %s1722_s1, %s1722_s1 }
  0x1f   :  { %p1729_p0 = por %p1728_p13, %p1727_p12 }
  0x21   :  { %p1730_p1 = pnand %p1729_p0, %p1723_p11 }
  0x23   :  { %1733 = shalt.err (!%p1730_p1)
}
  0x24   :  { %61 = dma.hbm_to_vmem [thread:$0]  %s2136_s3, 3072, %s56_s8, [#allocation9], %s1831_s28, %s1831_s28, %s1832_s29  }
  0x25   :  { %s1734_s22 = scalar_lea.hbm %s2133_s0, 384 }
  0x26   :  { %p1735_p2 = scmp.ne.s32.totalorder %s2133_s0, %s1734_s22  ;;  %p1738_p3 = scmp.lt.u32.totalorder %s1734_s22, %s2133_s0 }
  0x28   :  { %p1740_p4 = pnand %p1738_p3, %p1735_p2 }
  0x2a   :  { %1743 = shalt.err (!%p1740_p4)
}
  0x2b   :  { %s1744_s27 = scalar_lea.vmem %s20_s10, 384  ;;  %p1749_p6 = scmp.lt.s32.totalorder %s20_s10, %s20_s10 }
  0x2c   :  { %p1745_p5 = scmp.ne.s32.totalorder %s20_s10, %s1744_s27  ;;  %p1750_p7 = scmp.lt.s32.totalorder %s1744_s27, %s1744_s27 }
  0x2e   :  { %p1751_p8 = por %p1750_p7, %p1749_p6 }
  0x30   :  { %p1752_p9 = pnand %p1751_p8, %p1745_p5 }
  0x32   :  { %1755 = shalt.err (!%p1752_p9)
}
  0x33   :  { %s1835_s3 = smov 128   ;;  %s1836_s30 = smov 8  }
  0x34   :  { %25 = dma.hbm_to_vmem [thread:$0]  %s2133_s0, 384, %s20_s10, [#allocation3], %s1835_s3, %s1835_s3, %s1836_s30  }
  0x35   :  { %s1837_s8 = smov [#allocation7]   ;;  %s1838_s11 = smov [#allocation10]  }
  0x36   :  { %s43_s9 = sshll.u32 %s1837_s8, 4  ;;  %s67_s12 = sshll.u32 %s1838_s11, 4  ;;  %s44_s9 = int_to_ptr.vmem [resolvable:$true] %s43_s9  ;;  %s68_s12 = int_to_ptr.vmem [resolvable:$true] %s67_s12 }
  0x37   :  { %s1756_s15 = scalar_lea.hbm %s2135_s2, 3072 }
  0x38   :  { %p1757_p10 = scmp.ne.s32.totalorder %s2135_s2, %s1756_s15  ;;  %p1760_p11 = scmp.lt.u32.totalorder %s1756_s15, %s2135_s2 }
  0x3a   :  { %p1762_p12 = pnand %p1760_p11, %p1757_p10 }
  0x3c   :  { %1765 = shalt.err (!%p1762_p12)
}
  0x3d   :  { %s1766_s0 = scalar_lea.vmem %s44_s9, 3072  ;;  %p1771_p0 = scmp.lt.s32.totalorder %s44_s9, %s44_s9 }
  0x3e   :  { %p1767_p13 = scmp.ne.s32.totalorder %s44_s9, %s1766_s0  ;;  %p1772_p1 = scmp.lt.s32.totalorder %s1766_s0, %s1766_s0 }
  0x40   :  { %p1773_p2 = por %p1772_p1, %p1771_p0 }
  0x42   :  { %p1774_p3 = pnand %p1773_p2, %p1767_p13 }
  0x44   :  { %1777 = shalt.err (!%p1774_p3)
}
  0x45   :  { %49 = dma.hbm_to_vmem [thread:$0]  %s2135_s2, 3072, %s44_s9, [#allocation6], %s1831_s28, %s1831_s28, %s1832_s29  }
  0x46   :  { %s1778_s22 = scalar_lea.hbm %s2137_s4, 384 }
  0x47   :  { %p1779_p4 = scmp.ne.s32.totalorder %s2137_s4, %s1778_s22  ;;  %p1782_p5 = scmp.lt.u32.totalorder %s1778_s22, %s2137_s4 }
  0x49   :  { %p1784_p6 = pnand %p1782_p5, %p1779_p4 }
  0x4b   :  { %1787 = shalt.err (!%p1784_p6)
}
  0x4c   :  { %s1788_s27 = scalar_lea.vmem %s68_s12, 384  ;;  %p1793_p8 = scmp.lt.s32.totalorder %s68_s12, %s68_s12 }
  0x4d   :  { %p1789_p7 = scmp.ne.s32.totalorder %s68_s12, %s1788_s27  ;;  %p1794_p9 = scmp.lt.s32.totalorder %s1788_s27, %s1788_s27 }
  0x4f   :  { %p1795_p10 = por %p1794_p9, %p1793_p8 }
  0x51   :  { %p1796_p11 = pnand %p1795_p10, %p1789_p7 }
  0x53   :  { %1799 = shalt.err (!%p1796_p11)
}
  0x54   :  { %73 = dma.hbm_to_vmem [thread:$0]  %s2137_s4, 384, %s68_s12, [#allocation9], %s1835_s3, %s1835_s3, %s1836_s30  }
  0x55   :  { %1822 = dma.done.wait [#allocation3], 384  }
  0x56   :  { %1823 = vsyncadd [#allocation3], 4294966912 }
  0x57   :  { %1824 = dma.done.wait [#allocation6], 6144  }
  0x58   :  { %1825 = vsyncadd [#allocation6], 4294961152 }
  0x59   :  { %1826 = dma.done.wait [#allocation9], 3456  }
  0x5a   :  { %1827 = vsyncadd [#allocation9], 4294963840  ;;  %v1839_v0 = vmov 0.0   ;;  %vm1840_vm0 = vmmov 0   ;;  %v1606_v1 = vld [vmem:[#allocation5] sm:$0xff]   ;;  %v1607_v2 = vld [vmem:[#allocation5 + $0x8] sm:$0xff]   ;;  %v90_v31 = vlaneseq }
  0x5b   :  { %1414 = vmatprep.subr.bf16.mxu0 %v1839_v0  ;;  %1434 = vmatprep.subr.bf16.mxu1 %v1839_v0  ;;  %v1608_v3 = vld [vmem:[#allocation5 + $0x40] sm:$0xff]   ;;  %v1610_v4 = vld [vmem:[#allocation5 + $0x48] sm:$0xff]   ;;  %v1609_v5 = vld [vmem:[#allocation5 + $0x10] sm:$0xff]   ;;  %s1841_s4 = smov [#allocation11]  }
  0x5c   :  { %1430 = vmatprep.mubr.msk.bf16.mxu0 %vm1840_vm0, %v1839_v0  ;;  %1450 = vmatprep.mubr.msk.bf16.mxu1 %vm1840_vm0, %v1839_v0  ;;  %v1612_v6 = vld [vmem:[#allocation5 + $0x50] sm:$0xff]   ;;  %v1611_v7 = vld [vmem:[#allocation5 + $0x18] sm:$0xff]   ;;  %v1613_v9 = vld [vmem:[#allocation5 + $0x20] sm:$0xff]   ;;  %v1983_v32 = vshrl.u32 %v90_v31, 7  ;;  %v91_v35 = vand.u32 127, %v90_v31  ;;  %s1246_s29 = sshll.u32 %s1841_s4, 4  ;;  %s1247_s29 = int_to_ptr.vmem [resolvable:$true] %s1246_s29 }
  0x5d   :  { %1415 = vmatpush3.bf16.msra.mxu0 %v1606_v1  ;;  %1435 = vmatpush3.bf16.msra.mxu1 %v1608_v3  ;;  %v1614_v8 = vld [vmem:[#allocation5 + $0x58] sm:$0xff]   ;;  %v1616_v10 = vld [vmem:[#allocation5 + $0x60] sm:$0xff]   ;;  %v1615_v11 = vld [vmem:[#allocation5 + $0x28] sm:$0xff]   ;;  %s1800_s6 = scalar_lea.vmem %s1247_s29, 384  ;;  %p1805_p13 = scmp.lt.s32.totalorder %s1247_s29, %s1247_s29 }
  0x5e   :  { %1416 = vmatprep.subr.bf16.mxu0 %v1839_v0  ;;  %1436 = vmatprep.subr.bf16.mxu1 %v1839_v0  ;;  %v1618_v12 = vld [vmem:[#allocation5 + $0x68] sm:$0xff]   ;;  %v1617_v13 = vld [vmem:[#allocation5 + $0x30] sm:$0xff]   ;;  %v1619_v14 = vld [vmem:[#allocation5 + $0x38] sm:$0xff]   ;;  %v154_v33 = vsub.s32 0, %v1983_v32  ;;  %vm92_vm1 = vcmp.lt.s32.totalorder %v91_v35, 100  ;;  %p1801_p12 = scmp.ne.s32.totalorder %s1247_s29, %s1800_s6  ;;  %p1806_p0 = scmp.lt.s32.totalorder %s1800_s6, %s1800_s6 }
  0x5f   :  { %v1620_v15 = vld [vmem:[#allocation5 + $0x70] sm:$0xff]   ;;  %v95_v16 = vld [vmem:[#allocation2] sm:$0xff]  ;;  %v1621_v17 = vld [vmem:[#allocation5 + $0x78] sm:$0xff]   ;;  %v1993_v47 = vsel %vm92_vm1, 1.0, %v1839_v0 }
  0x60   :  { %v96_v18 = vld [vmem:[#allocation2 + $0x8] sm:$0xff]  ;;  %v1622_v19 = vld [vmem:[#allocation5 + $0x80] sm:$0xff]   ;;  %v101_v20 = vpack.c.bf16 %v95_v16, %v95_v16  ;;  %v1623_v22 = vld [vmem:[#allocation5 + $0x88] sm:$0xff]   ;;  %p1807_p1 = por %p1806_p0, %p1805_p13 }
  0x61   :  { %1417 = vmatpush3.bf16.msra.mxu0 %v1607_v2  ;;  %1437 = vmatpush3.bf16.msra.mxu1 %v1610_v4  ;;  %v102_v21 = vpack.c.bf16 %v96_v18, %v96_v18  ;;  %v1624_v23 = vld [vmem:[#allocation5 + $0x90] sm:$0xff]   ;;  %v1625_v24 = vld [vmem:[#allocation5 + $0x98] sm:$0xff]   ;;  %v1626_v25 = vld [vmem:[#allocation5 + $0xa0] sm:$0xff]  }
  0x62   :  { %1418 = vmatprep.subr.bf16.mxu0 %v1839_v0  ;;  %1438 = vmatprep.subr.bf16.mxu1 %v1839_v0  ;;  %v1627_v26 = vld [vmem:[#allocation5 + $0xa8] sm:$0xff]   ;;  %v1628_v27 = vld [vmem:[#allocation5 + $0xb0] sm:$0xff]   ;;  %v1629_v28 = vld [vmem:[#allocation5 + $0xb8] sm:$0xff]   ;;  %p1808_p2 = pnand %p1807_p1, %p1801_p12 }
  0x63   :  { %v97_v29 = vld [vmem:[#allocation2 + $0x10] sm:$0xff]  ;;  %v1986_v34 = vld [vmem:[#allocation10] sm:$0xff]  ;;  %v1988_v36 = vld [vmem:[#allocation10 + $0x8] sm:$0xff] }
  0x64   :  { %v103_v30 = vpack.c.bf16 %v97_v29, %v97_v29  ;;  %v155_v37 = vrot.slane %v1986_v34, %v154_v33  ;;  %v159_v38 = vrot.slane %v1988_v36, %v154_v33  ;;  %v1997_v56 = vld [vmem:[#allocation10 + $0x10] sm:$0xff]  ;;  %v1630_v3 = vld [vmem:[#allocation7] sm:$0xff]   ;;  %v1635_v18 = vld [vmem:[#allocation7 + $0x18] sm:$0xff]  }
  0x65   :  { %1419 = vmatpush3.bf16.msra.mxu0 %v1609_v5  ;;  %1439 = vmatpush3.bf16.msra.mxu1 %v1612_v6  ;;  %v163_v57 = vrot.slane %v1997_v56, %v154_v33  ;;  %v1632_v4 = vld [vmem:[#allocation7 + $0x40] sm:$0xff]   ;;  %v1631_v5 = vld [vmem:[#allocation7 + $0x8] sm:$0xff]   ;;  %v1633_v16 = vld [vmem:[#allocation7 + $0x10] sm:$0xff]  }
  0x66   :  { %1420 = vmatprep.subr.bf16.mxu0 %v1839_v0  ;;  %1440 = vmatprep.subr.bf16.mxu1 %v1839_v0  ;;  %v1643_v31 = vld [vmem:[#allocation7 + $0x38] sm:$0xff]   ;;  %v1644_v33 = vld [vmem:[#allocation7 + $0x70] sm:$0xff]  }
  0x67   :  { %v1645_v35 = vld [vmem:[#allocation7 + $0x78] sm:$0xff]  }
  0x69   :  { %1421 = vmatpush3.bf16.msra.mxu0 %v1611_v7  ;;  %1441 = vmatpush3.bf16.msra.mxu1 %v1614_v8 }
  0x6a   :  { %1422 = vmatprep.subr.bf16.mxu0 %v1839_v0  ;;  %1442 = vmatprep.subr.bf16.mxu1 %v1839_v0 }
  0x6d   :  { %1423 = vmatpush3.bf16.msra.mxu0 %v1613_v9  ;;  %1443 = vmatpush3.bf16.msra.mxu1 %v1616_v10 }
  0x6e   :  { %1424 = vmatprep.subr.bf16.mxu0 %v1839_v0  ;;  %1444 = vmatprep.subr.bf16.mxu1 %v1839_v0 }
  0x71   :  { %1425 = vmatpush3.bf16.msra.mxu0 %v1615_v11  ;;  %1445 = vmatpush3.bf16.msra.mxu1 %v1618_v12 }
  0x72   :  { %1426 = vmatprep.subr.bf16.mxu0 %v1839_v0  ;;  %1446 = vmatprep.subr.bf16.mxu1 %v1839_v0 }
  0x75   :  { %1427 = vmatpush3.bf16.msra.mxu0 %v1617_v13  ;;  %1447 = vmatpush3.bf16.msra.mxu1 %v1620_v15 }
  0x76   :  { %1428 = vmatprep.subr.bf16.mxu0 %v1839_v0  ;;  %1448 = vmatprep.subr.bf16.mxu1 %v1839_v0 }
  0x79   :  { %1429 = vmatpush3.bf16.msra.mxu0 %v1619_v14  ;;  %1449 = vmatpush3.bf16.msra.mxu1 %v1621_v17  ;;  %v1634_v17 = vld [vmem:[#allocation7 + $0x48] sm:$0xff]  }
  0x7a   :  { %1454 = vmatprep.subr.bf16.mxu0 %v1839_v0  ;;  %1474 = vmatprep.subr.bf16.mxu1 %v1839_v0 }
  0x7c   :  { %1431 = vmatmul.mubr.bf16.vlgmr.msra.gmra.mrb[0].mxu0 %v101_v20  ;;  %1451 = vmatmul.mubr.bf16.vlgmr.msra.gmra.mrb[0].mxu1 %v102_v21  ;;  %v1637_v20 = vld [vmem:[#allocation7 + $0x20] sm:$0xff]   ;;  %v1638_v21 = vld [vmem:[#allocation7 + $0x58] sm:$0xff]  }
  0x7d   :  { %1455 = vmatpush3.bf16.msra.mxu0 %v1622_v19  ;;  %1470 = vmatprep.mubr.msk.bf16.mxu0 %vm1840_vm0, %v1839_v0  ;;  %v1636_v19 = vld [vmem:[#allocation7 + $0x50] sm:$0xff]  }
  0x7e   :  { %1456 = vmatprep.subr.bf16.mxu0 %v1839_v0  ;;  %1490 = vmatprep.mubr.msk.bf16.mxu1 %vm1840_vm0, %v1839_v0 }
  0x7f   :  { %1475 = vmatpush3.bf16.msra.mxu1 %v1630_v3  ;;  %v1649_v3 = vld [vmem:[#allocation7 + $0x98] sm:$0xff]  }
  0x80   :  { %1476 = vmatprep.subr.bf16.mxu1 %v1839_v0 }
  0x81   :  { %1457 = vmatpush3.bf16.msra.mxu0 %v1623_v22  ;;  %v1639_v22 = vld [vmem:[#allocation7 + $0x28] sm:$0xff]  }
  0x82   :  { %1458 = vmatprep.subr.bf16.mxu0 %v1839_v0 }
  0x83   :  { %1477 = vmatpush3.bf16.msra.mxu1 %v1631_v5  ;;  %v1650_v5 = vld [vmem:[#allocation7 + $0xa0] sm:$0xff]  }
  0x84   :  { %1478 = vmatprep.subr.bf16.mxu1 %v1839_v0 }
  0x85   :  { %1459 = vmatpush3.bf16.msra.mxu0 %v1624_v23  ;;  %v1640_v23 = vld [vmem:[#allocation7 + $0x60] sm:$0xff]  }
  0x86   :  { %1460 = vmatprep.subr.bf16.mxu0 %v1839_v0 }
  0x87   :  { %1479 = vmatpush3.bf16.msra.mxu1 %v1633_v16  ;;  %v559_v16 = vsub.s32 3, %v1983_v32 }
  0x88   :  { %1480 = vmatprep.subr.bf16.mxu1 %v1839_v0 }
  0x89   :  { %1461 = vmatpush3.bf16.msra.mxu0 %v1625_v24 }
  0x8a   :  { %1462 = vmatprep.subr.bf16.mxu0 %v1839_v0 }
  0x8b   :  { %1481 = vmatpush3.bf16.msra.mxu1 %v1635_v18 }
  0x8c   :  { %1482 = vmatprep.subr.bf16.mxu1 %v1839_v0 }
  0x8d   :  { %1463 = vmatpush3.bf16.msra.mxu0 %v1626_v25 }
  0x8e   :  { %1464 = vmatprep.subr.bf16.mxu0 %v1839_v0 }
  0x8f   :  { %1483 = vmatpush3.bf16.msra.mxu1 %v1637_v20 }
  0x90   :  { %1484 = vmatprep.subr.bf16.mxu1 %v1839_v0 }
  0x91   :  { %1465 = vmatpush3.bf16.msra.mxu0 %v1627_v26 }
  0x92   :  { %1466 = vmatprep.subr.bf16.mxu0 %v1839_v0 }
  0x93   :  { %1485 = vmatpush3.bf16.msra.mxu1 %v1639_v22 }
  0x94   :  { %1486 = vmatprep.subr.bf16.mxu1 %v1839_v0 }
  0x95   :  { %1467 = vmatpush3.bf16.msra.mxu0 %v1628_v27  ;;  %v1641_v27 = vld [vmem:[#allocation7 + $0x30] sm:$0xff]  }
  0x96   :  { %1468 = vmatprep.subr.bf16.mxu0 %v1839_v0 }
  0x97   :  { %1487 = vmatpush3.bf16.msra.mxu1 %v1641_v27 }
  0x98   :  { %1488 = vmatprep.subr.bf16.mxu1 %v1839_v0 }
  0x99   :  { %1469 = vmatpush3.bf16.msra.mxu0 %v1629_v28  ;;  %v1642_v28 = vld [vmem:[#allocation7 + $0x68] sm:$0xff]  }
  0x9a   :  { %1494 = vmatprep.subr.bf16.mxu0 %v1839_v0 }
  0x9b   :  { %1489 = vmatpush3.bf16.msra.mxu1 %v1643_v31 }
  0x9c   :  { %1471 = vmatmul.mubr.bf16.vlgmr.msra.gmra.mrb[4].mxu0 %v103_v30  ;;  %1514 = vmatprep.subr.bf16.mxu1 %v1839_v0 }
  0x9d   :  { %1510 = vmatprep.mubr.msk.bf16.mxu0 %vm1840_vm0, %v1839_v0  ;;  %1495 = vmatpush3.bf16.msra.mxu0 %v1632_v4 }
  0x9e   :  { %1496 = vmatprep.subr.bf16.mxu0 %v1839_v0 }
  0xa1   :  { %1497 = vmatpush3.bf16.msra.mxu0 %v1634_v17  ;;  %v560_v17 = vrot.slane %v1986_v34, %v559_v16 }
  0xa2   :  { %1498 = vmatprep.subr.bf16.mxu0 %v1839_v0 }
  0xa5   :  { %1499 = vmatpush3.bf16.msra.mxu0 %v1636_v19 }
  0xa6   :  { %1500 = vmatprep.subr.bf16.mxu0 %v1839_v0 }
  0xa9   :  { %1501 = vmatpush3.bf16.msra.mxu0 %v1638_v21  ;;  %v564_v21 = vrot.slane %v1988_v36, %v559_v16 }
  0xaa   :  { %1502 = vmatprep.subr.bf16.mxu0 %v1839_v0 }
  0xad   :  { %1503 = vmatpush3.bf16.msra.mxu0 %v1640_v23 }
  0xae   :  { %1504 = vmatprep.subr.bf16.mxu0 %v1839_v0 }
  0xb1   :  { %1505 = vmatpush3.bf16.msra.mxu0 %v1642_v28 }
  0xb2   :  { %1506 = vmatprep.subr.bf16.mxu0 %v1839_v0 }
  0xb5   :  { %1507 = vmatpush3.bf16.msra.mxu0 %v1644_v33 }
  0xb6   :  { %1508 = vmatprep.subr.bf16.mxu0 %v1839_v0 }
  0xb9   :  { %1509 = vmatpush3.bf16.msra.mxu0 %v1645_v35 }
  0xba   :  { %1534 = vmatprep.subr.bf16.mxu0 %v1839_v0 }
 0x14f   :  { %v246_v39 = vpop.f32.mrb[0].mxu0  ;;  %v334_v43 = vpop.f32.mrb[0].mxu1 }
 0x150   :  { %v247_v40 = vadd.f32 %v246_v39, %v155_v37  ;;  %v1432_v41 = vpop.f32.mrb[1].mxu0  ;;  %v335_v46 = vadd.f32 %v334_v43, %v159_v38  ;;  %v1452_v48 = vpop.f32.mrb[1].mxu1  ;;  %v478_v43 = vsub.s32 1, %v1983_v32 }
 0x151   :  { %v249_v42 = vpop.f32.mrb[2].mxu0  ;;  %v337_v49 = vpop.f32.mrb[2].mxu1 }
 0x152   :  { %v431_v44 = vmul.f32 0.01, %v247_v40  ;;  %v1433_v45 = vpop.f32.mrb[3].mxu0  ;;  %vm428_vm2 = vcmp.ge.f32.partialorder %v247_v40, 0.0  ;;  %v432_v50 = vmul.f32 0.01, %v335_v46 }
 0x153   :  { %vm429_vm3 = vcmp.ge.f32.partialorder %v335_v46, 0.0  ;;  %v1453_v52 = vpop.f32.mrb[3].mxu1  ;;  %v479_v45 = vrot.slane %v1986_v34, %v478_v43 }
 0x154   :  { %v434_v51 = vsel %vm428_vm2, %v247_v40, %v431_v44  ;;  %v435_v54 = vsel %vm429_vm3, %v335_v46, %v432_v50  ;;  %v493_v44 = vsub.s32 2, %v1983_v32 }
 0x155   :  { %v437_v53 = vmul.f32 %v1993_v47, %v434_v51  ;;  %v438_v55 = vmul.f32 %v1993_v47, %v435_v54 }
 0x156   :  { %v494_v49 = vrot.slane %v1986_v34, %v493_v44 }
 0x157   :  { %440 = vadd.xlane.f32.xlu0 %v437_v53 }
 0x15b   :  { %442 = vadd.xlane.f32.xlu0 %v438_v55  ;;  %v498_v55 = vrot.slane %v1988_v36, %v493_v44 }
 0x16f   :  { %v422_v58 = vpop.f32.mrb[4].mxu0 }
 0x170   :  { %v423_v59 = vadd.f32 %v422_v58, %v163_v57  ;;  %v1472_v60 = vpop.f32.mrb[5].mxu0  ;;  %v1646_v57 = vld [vmem:[#allocation7 + $0x80] sm:$0xff]  }
 0x171   :  { %v425_v61 = vpop.f32.mrb[6].mxu0 }
 0x172   :  { %v433_v62 = vmul.f32 0.01, %v423_v59  ;;  %v1473_v63 = vpop.f32.mrb[7].mxu0  ;;  %vm430_vm4 = vcmp.ge.f32.partialorder %v423_v59, 0.0  ;;  %v1647_v61 = vld [vmem:[#allocation7 + $0x88] sm:$0xff]  }
 0x173   :  { %v1648_v63 = vld [vmem:[#allocation7 + $0x90] sm:$0xff]  }
 0x174   :  { %v436_v1 = vsel %vm430_vm4, %v423_v59, %v433_v62 }
 0x175   :  { %v439_v2 = vmul.f32 %v1993_v47, %v436_v1 }
 0x177   :  { %444 = vadd.xlane.f32.xlu1 %v439_v2 }
 0x1e4   :  { %v441_v6 = vpop.xlane.xlu0 %440 }
 0x1e5   :  { %v446_v7 = vmul.f32 0.01, %v441_v6  ;;  %v1651_v6 = vld [vmem:[#allocation7 + $0xa8] sm:$0xff]  }
 0x1e7   :  { %v449_v8 = vsub.f32 %v434_v51, %v446_v7  ;;  %v483_v51 = vrot.slane %v1988_v36, %v478_v43  ;;  %v1652_v7 = vld [vmem:[#allocation7 + $0xb0] sm:$0xff]  }
 0x1e8   :  { %v443_v9 = vpop.xlane.xlu0 %442 }
 0x1e9   :  { %v447_v10 = vmul.f32 0.01, %v443_v9  ;;  %v2005_v11 = vmul.f32 %v1993_v47, %v449_v8  ;;  %v487_v8 = vrot.slane %v1997_v56, %v478_v43 }
 0x1eb   :  { %v450_v12 = vsub.f32 %v435_v54, %v447_v10  ;;  %v455_v13 = vmul.f32 %v2005_v11, %v2005_v11 }
 0x1ed   :  { %458 = vadd.xlane.f32.xlu1 %v455_v13  ;;  %v2010_v14 = vmul.f32 %v1993_v47, %v450_v12  ;;  %v1653_v12 = vld [vmem:[#allocation7 + $0xb8] sm:$0xff]  }
 0x1ef   :  { %v456_v15 = vmul.f32 %v2010_v14, %v2010_v14 }
 0x1f1   :  { %460 = vadd.xlane.f32.xlu0 %v456_v15 }
 0x204   :  { %v445_v24 = vpop.xlane.xlu1 %444 }
 0x205   :  { %v448_v25 = vmul.f32 0.01, %v445_v24 }
 0x207   :  { %v451_v26 = vsub.f32 %v436_v1, %v448_v25 }
 0x209   :  { %v2023_v29 = vmul.f32 %v1993_v47, %v451_v26 }
 0x20b   :  { %v457_v30 = vmul.f32 %v2023_v29, %v2023_v29 }
 0x20d   :  { %462 = vadd.xlane.f32.xlu1 %v457_v30 }
 0x27a   :  { %v459_v37 = vpop.xlane.xlu1 %458 }
 0x27b   :  { %v464_v38 = vmul.f32 0.01, %v459_v37 }
 0x27d   :  { %v467_v39 = vadd.f32 1e-05, %v464_v38  ;;  %v568_v38 = vrot.slane %v1997_v56, %v559_v16 }
 0x27e   :  { %v461_v40 = vpop.xlane.xlu0 %460 }
 0x27f   :  { %1678 = vrsqrt.f32 %v467_v39  ;;  %v465_v41 = vmul.f32 0.01, %v461_v40 }
 0x281   :  { %v468_v42 = vadd.f32 1e-05, %v465_v41 }
 0x283   :  { %1680 = vrsqrt.f32 %v468_v42 }
 0x289   :  { %v1679_v46 = vpop.eup %1678 }
 0x28a   :  { %v473_v48 = vmul.f32 %v1679_v46, %v2005_v11  ;;  %v502_v11 = vrot.slane %v1997_v56, %v493_v44 }
 0x28c   :  { %v488_v50 = vmul.f32 %v479_v45, %v473_v48  ;;  %v1654_v48 = vld [vmem:[#allocation8] sm:$0xff]  }
 0x28d   :  { %v1681_v52 = vpop.eup %1680 }
 0x28e   :  { %v503_v53 = vadd.f32 %v494_v49, %v488_v50  ;;  %v474_v54 = vmul.f32 %v1681_v52, %v2010_v14  ;;  %v1656_v49 = vld [vmem:[#allocation8 + $0x40] sm:$0xff]   ;;  %v1655_v50 = vld [vmem:[#allocation8 + $0x8] sm:$0xff]  }
 0x290   :  { %v506_v58 = vpack.c.bf16 %v503_v53, %v503_v53  ;;  %v489_v59 = vmul.f32 %v483_v51, %v474_v54 }
 0x292   :  { %1491 = vmatmul.mubr.bf16.vlgmr.msra.gmra.mrb[4].mxu1 %v506_v58  ;;  %v504_v60 = vadd.f32 %v498_v55, %v489_v59 }
 0x293   :  { %1515 = vmatpush3.bf16.msra.mxu1 %v1646_v57  ;;  %1530 = vmatprep.mubr.msk.bf16.mxu1 %vm1840_vm0, %v1839_v0 }
 0x294   :  { %v507_v62 = vpack.c.bf16 %v504_v60, %v504_v60  ;;  %1516 = vmatprep.subr.bf16.mxu1 %v1839_v0 }
 0x296   :  { %1511 = vmatmul.mubr.bf16.vlgmr.msra.gmra.mrb[8].mxu0 %v507_v62  ;;  %v1657_v62 = vld [vmem:[#allocation8 + $0x10] sm:$0xff]  }
 0x297   :  { %1517 = vmatpush3.bf16.msra.mxu1 %v1647_v61  ;;  %1550 = vmatprep.mubr.msk.bf16.mxu0 %vm1840_vm0, %v1839_v0 }
 0x298   :  { %1518 = vmatprep.subr.bf16.mxu1 %v1839_v0  ;;  %1535 = vmatpush3.bf16.msra.mxu0 %v1654_v48 }
 0x299   :  { %1536 = vmatprep.subr.bf16.mxu0 %v1839_v0 }
 0x29a   :  { %v463_v1 = vpop.xlane.xlu1 %462 }
 0x29b   :  { %v466_v2 = vmul.f32 0.01, %v463_v1  ;;  %1519 = vmatpush3.bf16.msra.mxu1 %v1648_v63  ;;  %v1658_v63 = vld [vmem:[#allocation8 + $0x48] sm:$0xff]   ;;  %v1659_v1 = vld [vmem:[#allocation8 + $0x18] sm:$0xff]  }
 0x29c   :  { %1520 = vmatprep.subr.bf16.mxu1 %v1839_v0  ;;  %1537 = vmatpush3.bf16.msra.mxu0 %v1655_v50  ;;  %v1675_v50 = vld [vmem:[#allocation8 + $0xa8] sm:$0xff]  }
 0x29d   :  { %v469_v4 = vadd.f32 1e-05, %v466_v2  ;;  %1538 = vmatprep.subr.bf16.mxu0 %v1839_v0  ;;  %v1660_v2 = vld [vmem:[#allocation8 + $0x50] sm:$0xff]  }
 0x29f   :  { %1682 = vrsqrt.f32 %v469_v4  ;;  %1521 = vmatpush3.bf16.msra.mxu1 %v1649_v3  ;;  %v1661_v3 = vld [vmem:[#allocation8 + $0x20] sm:$0xff]   ;;  %v1662_v4 = vld [vmem:[#allocation8 + $0x58] sm:$0xff]  }
 0x2a0   :  { %1522 = vmatprep.subr.bf16.mxu1 %v1839_v0  ;;  %1539 = vmatpush3.bf16.msra.mxu0 %v1657_v62 }
 0x2a1   :  { %1540 = vmatprep.subr.bf16.mxu0 %v1839_v0 }
 0x2a3   :  { %1523 = vmatpush3.bf16.msra.mxu1 %v1650_v5 }
 0x2a4   :  { %1524 = vmatprep.subr.bf16.mxu1 %v1839_v0  ;;  %1541 = vmatpush3.bf16.msra.mxu0 %v1659_v1 }
 0x2a5   :  { %1542 = vmatprep.subr.bf16.mxu0 %v1839_v0 }
 0x2a7   :  { %1525 = vmatpush3.bf16.msra.mxu1 %v1651_v6 }
 0x2a8   :  { %1526 = vmatprep.subr.bf16.mxu1 %v1839_v0  ;;  %1543 = vmatpush3.bf16.msra.mxu0 %v1661_v3 }
 0x2a9   :  { %v1683_v9 = vpop.eup %1682  ;;  %1544 = vmatprep.subr.bf16.mxu0 %v1839_v0 }
 0x2aa   :  { %v475_v10 = vmul.f32 %v1683_v9, %v2023_v29 }
 0x2ab   :  { %1527 = vmatpush3.bf16.msra.mxu1 %v1652_v7  ;;  %v1663_v7 = vld [vmem:[#allocation8 + $0x28] sm:$0xff]  }
 0x2ac   :  { %1528 = vmatprep.subr.bf16.mxu1 %v1839_v0  ;;  %v490_v13 = vmul.f32 %v487_v8, %v475_v10  ;;  %v1664_v8 = vld [vmem:[#allocation8 + $0x60] sm:$0xff]   ;;  %1545 = vmatpush3.bf16.msra.mxu0 %v1663_v7 }
 0x2ad   :  { %1546 = vmatprep.subr.bf16.mxu0 %v1839_v0 }
 0x2ae   :  { %v505_v14 = vadd.f32 %v502_v11, %v490_v13  ;;  %v1665_v11 = vld [vmem:[#allocation8 + $0x30] sm:$0xff]  }
 0x2af   :  { %1529 = vmatpush3.bf16.msra.mxu1 %v1653_v12  ;;  %v1666_v12 = vld [vmem:[#allocation8 + $0x68] sm:$0xff]  }
 0x2b0   :  { %v508_v15 = vpack.c.bf16 %v505_v14, %v505_v14  ;;  %1554 = vmatprep.subr.bf16.mxu1 %v1839_v0  ;;  %1547 = vmatpush3.bf16.msra.mxu0 %v1665_v11  ;;  %v1667_v14 = vld [vmem:[#allocation8 + $0x38] sm:$0xff]  }
 0x2b1   :  { %1548 = vmatprep.subr.bf16.mxu0 %v1839_v0 }
 0x2b2   :  { %1531 = vmatmul.mubr.bf16.vlgmr.msra.gmra.mrb[8].mxu1 %v508_v15  ;;  %v1668_v15 = vld [vmem:[#allocation8 + $0x70] sm:$0xff]  }
 0x2b3   :  { %1570 = vmatprep.mubr.msk.bf16.mxu1 %vm1840_vm0, %v1839_v0  ;;  %1555 = vmatpush3.bf16.msra.mxu1 %v1656_v49  ;;  %v1674_v49 = vld [vmem:[#allocation8 + $0xa0] sm:$0xff]  }
 0x2b4   :  { %1556 = vmatprep.subr.bf16.mxu1 %v1839_v0  ;;  %1549 = vmatpush3.bf16.msra.mxu0 %v1667_v14 }
 0x2b5   :  { %1574 = vmatprep.subr.bf16.mxu0 %v1839_v0 }
 0x2b7   :  { %1557 = vmatpush3.bf16.msra.mxu1 %v1658_v63 }
 0x2b8   :  { %1558 = vmatprep.subr.bf16.mxu1 %v1839_v0 }
 0x2bb   :  { %1559 = vmatpush3.bf16.msra.mxu1 %v1660_v2 }
 0x2bc   :  { %1560 = vmatprep.subr.bf16.mxu1 %v1839_v0 }
 0x2bf   :  { %1561 = vmatpush3.bf16.msra.mxu1 %v1662_v4 }
 0x2c0   :  { %1562 = vmatprep.subr.bf16.mxu1 %v1839_v0 }
 0x2c3   :  { %1563 = vmatpush3.bf16.msra.mxu1 %v1664_v8 }
 0x2c4   :  { %1564 = vmatprep.subr.bf16.mxu1 %v1839_v0 }
 0x2c7   :  { %1565 = vmatpush3.bf16.msra.mxu1 %v1666_v12 }
 0x2c8   :  { %1566 = vmatprep.subr.bf16.mxu1 %v1839_v0 }
 0x2cb   :  { %1567 = vmatpush3.bf16.msra.mxu1 %v1668_v15 }
 0x2cc   :  { %1568 = vmatprep.subr.bf16.mxu1 %v1839_v0 }
 0x365   :  { %v651_v18 = vpop.f32.mrb[4].mxu1 }
 0x366   :  { %v652_v19 = vadd.f32 %v651_v18, %v560_v17  ;;  %v1492_v20 = vpop.f32.mrb[5].mxu1 }
 0x367   :  { %v654_v22 = vpop.f32.mrb[6].mxu1 }
 0x368   :  { %v836_v23 = vmul.f32 0.01, %v652_v19  ;;  %v1493_v24 = vpop.f32.mrb[7].mxu1  ;;  %vm833_vm5 = vcmp.ge.f32.partialorder %v652_v19, 0.0  ;;  %v883_v22 = vsub.s32 4, %v1983_v32 }
 0x369   :  { %v739_v25 = vpop.f32.mrb[8].mxu0 }
 0x36a   :  { %v740_v26 = vadd.f32 %v739_v25, %v564_v21  ;;  %v1512_v27 = vpop.f32.mrb[9].mxu0  ;;  %v839_v28 = vsel %vm833_vm5, %v652_v19, %v836_v23  ;;  %v898_v23 = vsub.s32 5, %v1983_v32  ;;  %v884_v24 = vrot.slane %v1986_v34, %v883_v22 }
 0x36b   :  { %v742_v29 = vpop.f32.mrb[10].mxu0  ;;  %v842_v30 = vmul.f32 %v1993_v47, %v839_v28 }
 0x36c   :  { %v837_v31 = vmul.f32 0.01, %v740_v26  ;;  %v1513_v33 = vpop.f32.mrb[11].mxu0  ;;  %vm834_vm6 = vcmp.ge.f32.partialorder %v740_v26, 0.0  ;;  %v899_v27 = vrot.slane %v1986_v34, %v898_v23  ;;  %v888_v29 = vrot.slane %v1988_v36, %v883_v22 }
 0x36d   :  { %845 = vadd.xlane.f32.xlu0 %v842_v30 }
 0x36e   :  { %v840_v35 = vsel %vm834_vm6, %v740_v26, %v837_v31 }
 0x36f   :  { %v843_v37 = vmul.f32 %v1993_v47, %v840_v35 }
 0x371   :  { %847 = vadd.xlane.f32.xlu1 %v843_v37  ;;  %v1670_v37 = vld [vmem:[#allocation8 + $0x80] sm:$0xff]  }
 0x385   :  { %v827_v39 = vpop.f32.mrb[8].mxu1 }
 0x386   :  { %v828_v40 = vadd.f32 %v827_v39, %v568_v38  ;;  %v1532_v41 = vpop.f32.mrb[9].mxu1 }
 0x387   :  { %v830_v42 = vpop.f32.mrb[10].mxu1  ;;  %v1671_v41 = vld [vmem:[#allocation8 + $0x88] sm:$0xff]  }
 0x388   :  { %v838_v43 = vmul.f32 0.01, %v828_v40  ;;  %v1533_v44 = vpop.f32.mrb[11].mxu1  ;;  %vm835_vm7 = vcmp.ge.f32.partialorder %v828_v40, 0.0 }
 0x38a   :  { %v841_v45 = vsel %vm835_vm7, %v828_v40, %v838_v43  ;;  %v1672_v43 = vld [vmem:[#allocation8 + $0x90] sm:$0xff]  }
 0x38b   :  { %v844_v46 = vmul.f32 %v1993_v47, %v841_v45 }
 0x38d   :  { %849 = vadd.xlane.f32.xlu0 %v844_v46  ;;  %v1673_v46 = vld [vmem:[#allocation8 + $0x98] sm:$0xff]  }
 0x3fa   :  { %v846_v51 = vpop.xlane.xlu0 %845 }
 0x3fb   :  { %v851_v52 = vmul.f32 0.01, %v846_v51  ;;  %v1676_v51 = vld [vmem:[#allocation8 + $0xb0] sm:$0xff]  }
 0x3fd   :  { %v854_v53 = vsub.f32 %v839_v28, %v851_v52  ;;  %v892_v52 = vrot.slane %v1997_v56, %v883_v22 }
 0x3fe   :  { %v848_v54 = vpop.xlane.xlu1 %847 }
 0x3ff   :  { %v852_v55 = vmul.f32 0.01, %v848_v54  ;;  %v2068_v57 = vmul.f32 %v1993_v47, %v854_v53 }
 0x401   :  { %v855_v58 = vsub.f32 %v840_v35, %v852_v55  ;;  %v860_v59 = vmul.f32 %v2068_v57, %v2068_v57  ;;  %v903_v35 = vrot.slane %v1988_v36, %v898_v23  ;;  %v907_v55 = vrot.slane %v1997_v56, %v898_v23 }
 0x403   :  { %863 = vadd.xlane.f32.xlu1 %v860_v59  ;;  %v2073_v60 = vmul.f32 %v1993_v47, %v855_v58 }
 0x405   :  { %v861_v61 = vmul.f32 %v2073_v60, %v2073_v60 }
 0x407   :  { %865 = vadd.xlane.f32.xlu0 %v861_v61  ;;  %v964_v61 = vsub.s32 6, %v1983_v32 }
 0x409   :  { %v965_v62 = vrot.slane %v1986_v34, %v964_v61  ;;  %v969_v3 = vrot.slane %v1988_v36, %v964_v61 }
 0x41a   :  { %v850_v5 = vpop.xlane.xlu0 %849 }
 0x41b   :  { %v853_v6 = vmul.f32 0.01, %v850_v5 }
 0x41d   :  { %v856_v9 = vsub.f32 %v841_v45, %v853_v6 }
 0x41f   :  { %v2086_v10 = vmul.f32 %v1993_v47, %v856_v9  ;;  %v1669_v47 = vld [vmem:[#allocation8 + $0x78] sm:$0xff]  }
 0x420   :  { %1569 = vmatpush3.bf16.msra.mxu1 %v1669_v47 }
 0x421   :  { %v862_v13 = vmul.f32 %v2086_v10, %v2086_v10 }
 0x423   :  { %867 = vadd.xlane.f32.xlu1 %v862_v13 }
 0x490   :  { %v864_v16 = vpop.xlane.xlu1 %863 }
 0x491   :  { %v869_v17 = vmul.f32 0.01, %v864_v16 }
 0x493   :  { %v872_v18 = vadd.f32 1e-05, %v869_v17 }
 0x494   :  { %v866_v19 = vpop.xlane.xlu0 %865 }
 0x495   :  { %1684 = vrsqrt.f32 %v872_v18  ;;  %v870_v20 = vmul.f32 0.01, %v866_v19 }
 0x497   :  { %v873_v21 = vadd.f32 1e-05, %v870_v20 }
 0x499   :  { %1686 = vrsqrt.f32 %v873_v21 }
 0x49f   :  { %v1685_v25 = vpop.eup %1684 }
 0x4a0   :  { %v878_v26 = vmul.f32 %v1685_v25, %v2068_v57  ;;  %v1677_v57 = vld [vmem:[#allocation8 + $0xb8] sm:$0xff]  }
 0x4a2   :  { %v893_v28 = vmul.f32 %v884_v24, %v878_v26 }
 0x4a3   :  { %v1687_v30 = vpop.eup %1686 }
 0x4a4   :  { %v879_v31 = vmul.f32 %v1687_v30, %v2073_v60  ;;  %v908_v33 = vadd.f32 %v899_v27, %v893_v28 }
 0x4a6   :  { %v911_v38 = vpack.c.bf16 %v908_v33, %v908_v33  ;;  %v894_v39 = vmul.f32 %v888_v29, %v879_v31 }
 0x4a8   :  { %1551 = vmatmul.mubr.bf16.vlgmr.msra.gmra.mrb[12].mxu0 %v911_v38  ;;  %v909_v40 = vadd.f32 %v903_v35, %v894_v39 }
 0x4a9   :  { %1575 = vmatpush3.bf16.msra.mxu0 %v1670_v37  ;;  %1590 = vmatprep.mubr.msk.bf16.mxu0 %vm1840_vm0, %v1839_v0 }
 0x4aa   :  { %v912_v42 = vpack.c.bf16 %v909_v40, %v909_v40  ;;  %1576 = vmatprep.subr.bf16.mxu0 %v1839_v0 }
 0x4ac   :  { %1571 = vmatmul.mubr.bf16.vlgmr.msra.gmra.mrb[12].mxu1 %v912_v42 }
 0x4ad   :  { %1577 = vmatpush3.bf16.msra.mxu0 %v1671_v41 }
 0x4ae   :  { %1578 = vmatprep.subr.bf16.mxu0 %v1839_v0 }
 0x4b0   :  { %v868_v44 = vpop.xlane.xlu1 %867 }
 0x4b1   :  { %v871_v45 = vmul.f32 0.01, %v868_v44  ;;  %1579 = vmatpush3.bf16.msra.mxu0 %v1672_v43 }
 0x4b2   :  { %1580 = vmatprep.subr.bf16.mxu0 %v1839_v0 }
 0x4b3   :  { %v874_v48 = vadd.f32 1e-05, %v871_v45 }
 0x4b5   :  { %1688 = vrsqrt.f32 %v874_v48  ;;  %1581 = vmatpush3.bf16.msra.mxu0 %v1673_v46 }
 0x4b6   :  { %1582 = vmatprep.subr.bf16.mxu0 %v1839_v0 }
 0x4b9   :  { %1583 = vmatpush3.bf16.msra.mxu0 %v1674_v49 }
 0x4ba   :  { %1584 = vmatprep.subr.bf16.mxu0 %v1839_v0 }
 0x4bd   :  { %1585 = vmatpush3.bf16.msra.mxu0 %v1675_v50 }
 0x4be   :  { %1586 = vmatprep.subr.bf16.mxu0 %v1839_v0 }
 0x4bf   :  { %v1689_v53 = vpop.eup %1688 }
 0x4c0   :  { %v880_v54 = vmul.f32 %v1689_v53, %v2086_v10  ;;  %v973_v10 = vrot.slane %v1997_v56, %v964_v61 }
 0x4c1   :  { %1587 = vmatpush3.bf16.msra.mxu0 %v1676_v51 }
 0x4c2   :  { %1588 = vmatprep.subr.bf16.mxu0 %v1839_v0  ;;  %v895_v58 = vmul.f32 %v892_v52, %v880_v54 }
 0x4c4   :  { %v910_v59 = vadd.f32 %v907_v55, %v895_v58 }
 0x4c5   :  { %1589 = vmatpush3.bf16.msra.mxu0 %v1677_v57 }
 0x4c6   :  { %v913_v60 = vpack.c.bf16 %v910_v59, %v910_v59 }
 0x4c8   :  { %1591 = vmatmul.mubr.bf16.vlgmr.msra.gmra.mrb[16].mxu0 %v913_v60 }
 0x57b   :  { %v1056_v63 = vpop.f32.mrb[12].mxu0 }
 0x57c   :  { %v1057_v1 = vadd.f32 %v1056_v63, %v965_v62  ;;  %v1552_v2 = vpop.f32.mrb[13].mxu0 }
 0x57d   :  { %v1059_v4 = vpop.f32.mrb[14].mxu0 }
 0x57e   :  { %1238 = vst [vmem:[#allocation11] sm:$0xff] %v1057_v1  ;;  %v1553_v5 = vpop.f32.mrb[15].mxu0 }
 0x57f   :  { %v1144_v6 = vpop.f32.mrb[12].mxu1 }
 0x580   :  { %v1145_v7 = vadd.f32 %v1144_v6, %v969_v3  ;;  %v1572_v0 = vpop.f32.mrb[13].mxu1 }
 0x581   :  { %v1147_v8 = vpop.f32.mrb[14].mxu1 }
 0x582   :  { %1239 = vst [vmem:[#allocation11 + $0x8] sm:$0xff] %v1145_v7  ;;  %v1573_v9 = vpop.f32.mrb[15].mxu1 }
 0x59b   :  { %v1232_v32 = vpop.f32.mrb[16].mxu0 }
 0x59c   :  { %v1233_v34 = vadd.f32 %v1232_v32, %v973_v10  ;;  %v1592_v11 = vpop.f32.mrb[17].mxu0 }
 0x59d   :  { %v1235_v12 = vpop.f32.mrb[18].mxu0 }
 0x59e   :  { %1240 = vst [vmem:[#allocation11 + $0x10] sm:$0xff] %v1233_v34  ;;  %v1593_v36 = vpop.f32.mrb[19].mxu0 }
 0x59f   :  { %1811 = shalt.err (!%p1808_p2)
}
 0x5a0   :  { %s1812_s9 = scalar_lea.hbm %s2138_s5, 384 }
 0x5a1   :  { %p1813_p3 = scmp.ne.s32.totalorder %s2138_s5, %s1812_s9  ;;  %p1816_p4 = scmp.lt.u32.totalorder %s1812_s9, %s2138_s5 }
 0x5a3   :  { %p1818_p5 = pnand %p1816_p4, %p1813_p3 }
 0x5a5   :  { %1821 = shalt.err (!%p1818_p5)
}
 0x5a6   :  { %1252 = dma.vmem_to_hbm [thread:$0]  %s1247_s29, 384, %s2138_s5, [#allocation4], %s1835_s3, %s1835_s3, %s1836_s30  }
 0x5a7   :  { %1828 = dma.done.wait [#allocation4], 384  }
 0x5a8   :  { %1829 = vsyncadd [#allocation4], 4294966912 }
 0x5a9   :  { %1256 = vsyncpa [#allocation3], 1 }
 0x5aa   :  { %1257 = vsyncpa [#allocation6], 1 }
 0x5ab   :  { %1258 = vsyncpa [#allocation9], 1 }
 0x5ac   :  { %1259 = vsyncpa [#allocation4], 1 }

</bundles_post_ra>
